<compile_context>
chip_gen: v5e
topology: v5e:2x2
jax: 0.10.0
libtpu: 0.0.40
codegen_flags: <defaults>
</compile_context>

<pallas_src>
import jax
import jax.numpy as jnp
from jax import lax
from jax.experimental import pallas as pl
from jax.experimental.pallas import tpu as pltpu


def _embeddings_kernel(x_ref, w_ref, b_ref, pos_ref, o_ref):
    # x_ref:   (1, C, TN)    channels-major token tile for one batch element
    # w_ref:   (C, HID)      1x1-conv weight (shared across the grid)
    # b_ref:   (1, HID)      conv bias
    # pos_ref: (1, TN, HID)  position-embedding tile (reused across batch)
    # o_ref:   (1, TN, HID)
    x_cn = x_ref[0]                       # (C, TN) -- lane-dense in TN
    w = w_ref[...]                        # (C, HID)
    # Contract over C (dim 0 of both operands) -> (TN, HID); MXU matmul with
    # f32 accumulation.  Equivalent to pl.dot(x_cn, w, trans_a=True).
    acc = lax.dot_general(
        x_cn, w,
        dimension_numbers=(((0,), (0,)), ((), ())),
        preferred_element_type=jnp.float32)
    acc = acc + b_ref[...]                # (1, HID) broadcast over rows (VPU)
    acc = acc + pos_ref[0]                # (TN, HID)                    (VPU)
    o_ref[0] = acc.astype(o_ref.dtype)


def _pick_tile_n(n_tokens, target, hid, itemsize, vmem_budget_bytes=24 << 20):
    """Largest multiple-of-128 divisor of n_tokens that is <= target and keeps
    the double-buffered pos+out tiles under the VMEM budget (v7x-safe)."""
    # double-buffered (pos tile + out tile) ~= 4 * tile_n * hid * itemsize
    cap = max(128, vmem_budget_bytes // (4 * hid * itemsize))
    target = min(target, cap, n_tokens)
    lane_divs = [d for d in range(128, n_tokens + 1, 128) if n_tokens % d == 0]
    if not lane_divs:
        # No lane-aligned divisor (e.g. N=196): fall back to the full sequence
        # per step -- block dims equal to the array dims always satisfy the
        # (8, 128) tiling rule.
        return n_tokens
    fits = [d for d in lane_divs if d <= target]
    return max(fits) if fits else min(lane_divs)


def embeddings_forward(x_nchw, conv_w, conv_b, pos_emb, *, tile_n=2048):
    """TransUNet Embeddings forward (non-hybrid path).

    x_nchw : (B, C, H, W)   input image, NCHW
    conv_w : (HID, C)       1x1-conv weight (torch (HID, C, 1, 1) squeezed)
    conv_b : (HID,)         conv bias
    pos_emb: (1, N, HID)    position embeddings, N = H*W
    tile_n : target tokens per grid step (auto-clamped / snapped to a divisor)
    """
    B, C, H, W = x_nchw.shape
    HID = conv_w.shape[0]
    N = H * W
    assert pos_emb.shape == (1, N, HID)

    # Free, row-major view of NCHW as (B, C, N): no transpose of x.
    x_cn = x_nchw.reshape(B, C, N)
    w_ck = conv_w.T                       # (C, HID) -- tiny, one-off
    b_row = conv_b.reshape(1, HID)

    itemsize = max(jnp.dtype(x_nchw.dtype).itemsize,
                   jnp.dtype(pos_emb.dtype).itemsize)
    tn = _pick_tile_n(N, tile_n, HID, itemsize)
    num_tiles = N // tn

    # Explicit VMEM limit: double-buffered pos+out tiles can exceed the 16 MiB
    # scoped default on v5e; keep headroom under v7x's 64 MiB per-TC VMEM.
    est_bytes = 2 * (2 * tn * HID * itemsize      # pos tile + out tile
                     + C * tn * itemsize          # x tile
                     + (C + 1) * HID * itemsize)  # weight + bias
    vmem_limit = int(min(56 << 20, max(32 << 20, est_bytes + (8 << 20))))

    # Advisory cost estimate for XLA's scheduler (kernel is HBM-bound).
    out_itemsize = jnp.dtype(x_nchw.dtype).itemsize
    bytes_accessed = int(
        x_cn.size * jnp.dtype(x_cn.dtype).itemsize
        + w_ck.size * jnp.dtype(w_ck.dtype).itemsize
        + b_row.size * jnp.dtype(b_row.dtype).itemsize
        + pos_emb.size * jnp.dtype(pos_emb.dtype).itemsize
        + B * N * HID * out_itemsize)
    cost = pl.CostEstimate(
        flops=int(2 * B * N * C * HID + 2 * B * N * HID),
        transcendentals=0,
        bytes_accessed=bytes_accessed)

    grid = (num_tiles, B)   # batch innermost -> pos tile reused across B
    out = pl.pallas_call(
        _embeddings_kernel,
        out_shape=jax.ShapeDtypeStruct((B, N, HID), x_nchw.dtype),
        grid_spec=pltpu.PrefetchScalarGridSpec(
            num_scalar_prefetch=0,
            grid=grid,
            in_specs=[
                pl.BlockSpec((1, C, tn), lambda n, b: (b, 0, n)),
                pl.BlockSpec((C, HID), lambda n, b: (0, 0)),
                pl.BlockSpec((1, HID), lambda n, b: (0, 0)),
                # Independent of b -> DMA elided across the inner batch loop:
                # each pos tile is fetched once and reused B times.
                pl.BlockSpec((1, tn, HID), lambda n, b: (0, n, 0)),
            ],
            out_specs=pl.BlockSpec((1, tn, HID), lambda n, b: (b, n, 0)),
        ),
        compiler_params=pltpu.CompilerParams(
            dimension_semantics=("parallel", "parallel"),
            vmem_limit_bytes=vmem_limit,
        ),
        cost_estimate=cost,
    )(x_cn, w_ck, b_row, pos_emb)

    # TODO(synk): dropout is identity in eval mode (rate not applied here).
    features = None   # non-hybrid path of the module
    return out, features


if __name__ == "__main__":
    key = jax.random.PRNGKey(0)
    k_x, k_w, k_b, k_p = jax.random.split(key, 4)

    # Small shapes consistent with the non-hybrid forward:
    B, C, H, W = 2, 4, 16, 16          # input image (NCHW)
    HID = 32                           # params['hidden_size']
    N = H * W                          # n_patches from the 1x1 conv, stride 1

    x = jax.random.normal(k_x, (B, C, H, W), dtype=jnp.float32)
    conv_w = jax.random.normal(k_w, (HID, C), dtype=jnp.float32) * 0.1
    conv_b = jax.random.normal(k_b, (HID,), dtype=jnp.float32) * 0.1
    # Module initializes position_embeddings to zeros; use small random values
    # here so the pos-emb add is actually exercised by the numeric check.
    pos_emb = jax.random.normal(k_p, (1, N, HID), dtype=jnp.float32) * 0.02

    emb, feats = embeddings_forward(x, conv_w, conv_b, pos_emb)
    emb = jax.block_until_ready(emb)

    # Reference (pure JAX): 1x1 conv == channel contraction per pixel.
    ref = jnp.einsum("bchw,oc->bhwo", x, conv_w).reshape(B, N, HID) + conv_b
    ref = ref + pos_emb
    assert emb.shape == (B, N, HID)
    assert feats is None
    assert jnp.allclose(emb, ref, atol=1e-5, rtol=1e-5)

    print("KERNEL_OK")
</pallas_src>

<mosaic_0001>
module attributes {stable_mosaic.version = 11 : i64} {
  func.func @_embeddings_kernel(%arg0: i32, %arg1: i32, %arg2: memref<1x4x256xf32, #tpu.memory_space<vmem>>, %arg3: memref<4x32xf32, #tpu.memory_space<vmem>>, %arg4: memref<1x32xf32, #tpu.memory_space<vmem>>, %arg5: memref<1x256x32xf32, #tpu.memory_space<vmem>>, %arg6: memref<1x256x32xf32, #tpu.memory_space<vmem>>) attributes {dimension_semantics = [#tpu.dimension_semantics<parallel>, #tpu.dimension_semantics<parallel>], iteration_bounds = array<i64: 1, 2>, scalar_prefetch = 0 : i64, scratch_operands = 0 : i64, tpu.core_type = #tpu.core_type<tc>, window_params = [{transform_indices = @transform_0, window_bounds = array<i64: 1, 4, 256>}, {pipeline_mode = #tpu.pipeline_mode<synchronous>, transform_indices = @transform_1, window_bounds = array<i64: 4, 32>}, {pipeline_mode = #tpu.pipeline_mode<synchronous>, transform_indices = @transform_2, window_bounds = array<i64: 1, 32>}, {transform_indices = @transform_3, window_bounds = array<i64: 1, 256, 32>}, {transform_indices = @transform_4, window_bounds = array<i64: 1, 256, 32>}]} {
    %c0 = arith.constant 0 : index
    %c0_0 = arith.constant 0 : index
    %c0_1 = arith.constant 0 : index
    %0 = vector.load %arg2[%c0, %c0_0, %c0_1] : memref<1x4x256xf32, #tpu.memory_space<vmem>>, vector<1x4x256xf32>
    %1 = vector.shape_cast %0 : vector<1x4x256xf32> to vector<4x256xf32>
    %c0_2 = arith.constant 0 : index
    %c0_3 = arith.constant 0 : index
    %2 = vector.load %arg3[%c0_2, %c0_3] : memref<4x32xf32, #tpu.memory_space<vmem>>, vector<4x32xf32>
    %cst = arith.constant dense<0.000000e+00> : vector<256x32xf32>
    %3 = tpu.matmul %1, %2, %cst {dimension_numbers = #tpu.dot_dimension_numbers<[0], [0], [1], [1], [0, 1, 1, 1], [], []>} : vector<4x256xf32>, vector<4x32xf32>, vector<256x32xf32> -> vector<256x32xf32>
    %c0_4 = arith.constant 0 : index
    %c0_5 = arith.constant 0 : index
    %4 = vector.load %arg4[%c0_4, %c0_5] : memref<1x32xf32, #tpu.memory_space<vmem>>, vector<1x32xf32>
    %5 = vector.broadcast %4 : vector<1x32xf32> to vector<256x32xf32>
    %6 = arith.addf %3, %5 : vector<256x32xf32>
    %c0_6 = arith.constant 0 : index
    %c0_7 = arith.constant 0 : index
    %c0_8 = arith.constant 0 : index
    %7 = vector.load %arg5[%c0_6, %c0_7, %c0_8] : memref<1x256x32xf32, #tpu.memory_space<vmem>>, vector<1x256x32xf32>
    %8 = vector.shape_cast %7 : vector<1x256x32xf32> to vector<256x32xf32>
    %9 = arith.addf %6, %8 : vector<256x32xf32>
    %c0_9 = arith.constant 0 : index
    %c0_10 = arith.constant 0 : index
    %c0_11 = arith.constant 0 : index
    %10 = vector.load %arg6[%c0_9, %c0_10, %c0_11] : memref<1x256x32xf32, #tpu.memory_space<vmem>>, vector<1x256x32xf32>
    %11 = vector.shape_cast %10 : vector<1x256x32xf32> to vector<256x32xf32>
    %12 = vector.shape_cast %9 : vector<256x32xf32> to vector<1x256x32xf32>
    tpu.vector_store %arg6[%c0_9, %c0_10, %c0_11], %12 {strides = array<i32>} : memref<1x256x32xf32, #tpu.memory_space<vmem>>, vector<1x256x32xf32>,
    return
  }
  func.func @transform_0(%arg0: i32, %arg1: i32) -> (i32, i32, i32) {
    %c0_i32 = arith.constant 0 : i32
    %c0_i32_0 = arith.constant 0 : i32
    return %arg1, %c0_i32, %arg0 : i32, i32, i32
  }
  func.func @transform_1(%arg0: i32, %arg1: i32) -> (i32, i32) {
    %c0_i32 = arith.constant 0 : i32
    %c0_i32_0 = arith.constant 0 : i32
    %c0_i32_1 = arith.constant 0 : i32
    return %c0_i32, %c0_i32_0 : i32, i32
  }
  func.func @transform_2(%arg0: i32, %arg1: i32) -> (i32, i32) {
    %c0_i32 = arith.constant 0 : i32
    %c0_i32_0 = arith.constant 0 : i32
    %c0_i32_1 = arith.constant 0 : i32
    return %c0_i32, %c0_i32_0 : i32, i32
  }
  func.func @transform_3(%arg0: i32, %arg1: i32) -> (i32, i32, i32) {
    %c0_i32 = arith.constant 0 : i32
    %c0_i32_0 = arith.constant 0 : i32
    %c0_i32_1 = arith.constant 0 : i32
    return %c0_i32, %arg0, %c0_i32_0 : i32, i32, i32
  }
  func.func @transform_4(%arg0: i32, %arg1: i32) -> (i32, i32, i32) {
    %c0_i32 = arith.constant 0 : i32
    %c0_i32_0 = arith.constant 0 : i32
    return %arg1, %arg0, %c0_i32 : i32, i32, i32
  }
}

</mosaic_0001>

<bundles_post_ra>
// kernel: tpu_custom_call.1
= control target key start
LH: loop header
LB: loop body
LE: loop exit
PB: predicated region body
PF: predicated region fallthrough
CT: control target
= control target key end

     0   :  { %s873_s15 = smov 0   ;;  %s875_s16 = smov 0   ;;  %s1144_s0 = inlined_call_operand.vmem [shape: f32[2,4,256], index: 0, kind: input, shape index: {}]   ;;  %s1145_s1 = inlined_call_operand.vmem [shape: f32[4,32], index: 1, kind: input, shape index: {}]   ;;  %s1146_s2 = inlined_call_operand.vmem [shape: f32[1,32], index: 2, kind: input, shape index: {}]   ;;  %s1147_s3 = inlined_call_operand.vmem [shape: f32[1,256,32], index: 3, kind: input, shape index: {}]   ;;  %s1148_s4 = inlined_call_operand.vmem [shape: f32[2,256,32], index: 4, kind: output, shape index: {}]  }
   0x1   :  { %s877_s17 = smov 0  }
   0x2 LB: > { %s23_s18 = sadd.s32 1, %s842_s16  ;;  %p753_p0 = scmp.ge.s32.totalorder %s846_s17, 1  ;;  %s846_s17 = sphi %s877_s17, %s14_s17   ;;  %s842_s16 = sphi %s875_s16, %s1150_s16   ;;  %s838_s15 = sphi %s873_s15, %s1149_s15  }
   0x3   : > { %p24_p1 = scmp.ge.s32.totalorder %s23_s18, 2  ;;  %p194_p2 = scmp.lt.s32.totalorder %s846_s17, 3 }
   0x5   : > { %s1152_s18 = smov (%p24_p1, %s23_s18), 0  ;;  %p195_p3 = pnand %p753_p0, %p194_p2 }
   0x6   : > { %p234_p4 = scmp.lt.s32.totalorder (!%p195_p3), %s838_s15, 1 }
   0x7   : > { %198 = sbr.rel (%p195_p3) target bundleno = 568 (0x238), region = 36 }
   0xc   : > { %s1154_s15 = smov (!%p234_p4, %s838_s15), 1  ;;  %v260_v2 = vld [vmem:[%s1145_s1] sm:$0xf]  ;;  %vm432_vm0 = vcmask 1043456   ;;  %vm335_vm1 = vcmask 31744   ;;  %vm613_vm2 = vcmask 261120  }
   0xd   : > { %s793_s19 = sshll.u32 %s1154_s15, 3  ;;  %796 = vmatpush.msk.msra.mxu2 %vm432_vm0, %v260_v2  ;;  %797 = vmatpush.msk.msra.mxu3 %vm432_vm0, %v260_v2  ;;  %v920_v21 = vld [vmem:[%s1146_s2] ss:$0 sm:$0xff]  ;;  %s794_s27 = sshll.u32 %s1154_s15, 8  ;;  %v566_v28 = vld [vmem:[%s1147_s3 + $0x88] sm:$0xff]  ;;  %v567_v33 = vld [vmem:[%s1147_s3 + $0x90] sm:$0xff] }
   0xe   : > { %s241_s22 = scalar_lea.vmem %s1144_s0, %s793_s19  ;;  %758 = vmatpush.msk.msra.mxu0 %vm432_vm0, %v260_v2  ;;  %795 = vmatpush.msk.msra.mxu1 %vm432_vm0, %v260_v2  ;;  %v565_v23 = vld [vmem:[%s1147_s3 + $0x80] sm:$0xff]  ;;  %s930_s6 = scalar_lea.vmem %s1148_s4, %s794_s27  ;;  %v568_v38 = vld [vmem:[%s1147_s3 + $0x98] sm:$0xff]  ;;  %v570_v48 = vld [vmem:[%s1147_s3 + $0xa8] sm:$0xff] }
   0xf   : > { %v259_v0 = vld [vmem:[%s241_s22] sm:$0xff]  ;;  %v571_v53 = vld [vmem:[%s1147_s3 + $0xb0] sm:$0xff]  ;;  %v572_v58 = vld [vmem:[%s1147_s3 + $0xb8] sm:$0xff] }
  0x10   : > { %266 = vst [vmem:[#allocation1] ss:$2 sm:$0xff] %v259_v0  ;;  %v569_v43 = vld [vmem:[%s1147_s3 + $0xa0] sm:$0xff] }
  0x11   : > { %v573_v63 = vld [vmem:[%s1147_s3 + $0xc0] sm:$0xff] }
  0x17   : > { %v268_v1 = vld.sshfl [vmem:[#allocation1 + $0x8] sm:$0xff pattern:$0x75316420]  ;;  %v267_v3 = vld.sshfl [vmem:[#allocation1] sm:$0xff pattern:$0x75316420] }
  0x18   : > { %303 = vxpose.xlu0.b32.start.end [1/1] (short) %v268_v1, 128 }
  0x98   : > { %271 = vxpose.xlu0.b32.start.end [1/1] (short) %v267_v3, 128 }
  0xbc   : > { %v319_v4 = vpop.trf.xlu0 }
  0xbd   : > { %775 = vmatmul.msk.f32.vlgmr.msra.gmra.mxu2 %vm335_vm1, %v319_v4  ;;  %v574_v4 = vld [vmem:[%s1147_s3 + $0xc8] sm:$0xff] }
  0xc4   : > { %v320_v5 = vpop.trf.xlu0 }
  0xc5   : > { %776 = vmatmul.msk.f32.gmra.mxu2 %vm335_vm1, %v320_v5 }
  0xcc   : > { %v321_v6 = vpop.trf.xlu0 }
  0xcd   : > { %777 = vmatmul.msk.f32.gmra.mxu2 %vm335_vm1, %v321_v6 }
  0xd4   : > { %v322_v7 = vpop.trf.xlu0 }
  0xd5   : > { %778 = vmatmul.msk.f32.gmra.mxu2 %vm335_vm1, %v322_v7 }
  0xdc   : > { %v323_v8 = vpop.trf.xlu0 }
  0xdd   : > { %779 = vmatmul.msk.f32.gmra.mxu2 %vm335_vm1, %v323_v8 }
  0xe4   : > { %v324_v9 = vpop.trf.xlu0 }
  0xe5   : > { %780 = vmatmul.msk.f32.gmra.mxu2 %vm335_vm1, %v324_v9  ;;  %v575_v9 = vld [vmem:[%s1147_s3 + $0xd0] sm:$0xff] }
  0xec   : > { %v325_v10 = vpop.trf.xlu0 }
  0xed   : > { %781 = vmatmul.msk.f32.gmra.mxu2 %vm335_vm1, %v325_v10 }
  0xf4   : > { %v326_v11 = vpop.trf.xlu0 }
  0xf5   : > { %782 = vmatmul.msk.f32.gmra.mxu2 %vm335_vm1, %v326_v11 }
  0xfc   : > { %v327_v12 = vpop.trf.xlu0 }
  0xfd   : > { %783 = vmatmul.msk.f32.vlgmr.msra.gmra.mxu3 %vm335_vm1, %v327_v12 }
 0x104   : > { %v328_v13 = vpop.trf.xlu0 }
 0x105   : > { %784 = vmatmul.msk.f32.gmra.mxu3 %vm335_vm1, %v328_v13 }
 0x10c   : > { %v329_v14 = vpop.trf.xlu0 }
 0x10d   : > { %785 = vmatmul.msk.f32.gmra.mxu3 %vm335_vm1, %v329_v14  ;;  %v576_v14 = vld [vmem:[%s1147_s3 + $0xd8] sm:$0xff] }
 0x114   : > { %v330_v15 = vpop.trf.xlu0 }
 0x115   : > { %786 = vmatmul.msk.f32.gmra.mxu3 %vm335_vm1, %v330_v15 }
 0x11c   : > { %v331_v16 = vpop.trf.xlu0 }
 0x11d   : > { %787 = vmatmul.msk.f32.gmra.mxu3 %vm335_vm1, %v331_v16 }
 0x124   : > { %v332_v17 = vpop.trf.xlu0 }
 0x125   : > { %788 = vmatmul.msk.f32.gmra.mxu3 %vm335_vm1, %v332_v17 }
 0x12c   : > { %v333_v18 = vpop.trf.xlu0 }
 0x12d   : > { %789 = vmatmul.msk.f32.gmra.mxu3 %vm335_vm1, %v333_v18 }
 0x134   : > { %v334_v19 = vpop.trf.xlu0 }
 0x135   : > { %790 = vmatmul.msk.f32.gmra.mxu3 %vm335_vm1, %v334_v19  ;;  %v577_v19 = vld [vmem:[%s1147_s3 + $0xe0] sm:$0xff] }
 0x13c   : > { %v287_v20 = vpop.trf.xlu0 }
 0x13d   : > { %759 = vmatmul.msk.f32.vlgmr.msra.gmra.mxu0 %vm335_vm1, %v287_v20 }
 0x140   : > { %v501_v22 = vpop.f32.mrf.mxu2 }
 0x141   : > { %v502_v24 = vadd.f32 %v920_v21, %v501_v22 }
 0x143   : > { %v597_v25 = vadd.f32 %v565_v23, %v502_v24 }
 0x144   : > { %v288_v26 = vpop.trf.xlu0 }
 0x145   : > { %630 = vst.msk [vmem:[%s930_s6 + $0x80] sm:$0xff] %vm613_vm2, %v597_v25  ;;  %760 = vmatmul.msk.f32.gmra.mxu0 %vm335_vm1, %v288_v26  ;;  %v578_v25 = vld [vmem:[%s1147_s3 + $0xe8] sm:$0xff] }
 0x148   : > { %v504_v27 = vpop.f32.mrf.mxu2 }
 0x149   : > { %v505_v29 = vadd.f32 %v920_v21, %v504_v27 }
 0x14b   : > { %v598_v30 = vadd.f32 %v566_v28, %v505_v29 }
 0x14c   : > { %v289_v31 = vpop.trf.xlu0 }
 0x14d   : > { %631 = vst.msk [vmem:[%s930_s6 + $0x88] sm:$0xff] %vm613_vm2, %v598_v30  ;;  %761 = vmatmul.msk.f32.gmra.mxu0 %vm335_vm1, %v289_v31  ;;  %v579_v30 = vld [vmem:[%s1147_s3 + $0xf0] sm:$0xff] }
 0x150   : > { %v507_v32 = vpop.f32.mrf.mxu2 }
 0x151   : > { %v508_v34 = vadd.f32 %v920_v21, %v507_v32 }
 0x153   : > { %v599_v35 = vadd.f32 %v567_v33, %v508_v34 }
 0x154   : > { %v290_v36 = vpop.trf.xlu0 }
 0x155   : > { %632 = vst.msk [vmem:[%s930_s6 + $0x90] sm:$0xff] %vm613_vm2, %v599_v35  ;;  %762 = vmatmul.msk.f32.gmra.mxu0 %vm335_vm1, %v290_v36  ;;  %v580_v35 = vld [vmem:[%s1147_s3 + $0xf8] sm:$0xff] }
 0x158   : > { %v510_v37 = vpop.f32.mrf.mxu2 }
 0x159   : > { %v511_v39 = vadd.f32 %v920_v21, %v510_v37 }
 0x15b   : > { %v600_v40 = vadd.f32 %v568_v38, %v511_v39  ;;  %v549_v38 = vld [vmem:[%s1147_s3] sm:$0xff] }
 0x15c   : > { %v291_v41 = vpop.trf.xlu0 }
 0x15d   : > { %633 = vst.msk [vmem:[%s930_s6 + $0x98] sm:$0xff] %vm613_vm2, %v600_v40  ;;  %763 = vmatmul.msk.f32.gmra.mxu0 %vm335_vm1, %v291_v41 }
 0x160   : > { %v513_v42 = vpop.f32.mrf.mxu2 }
 0x161   : > { %v514_v44 = vadd.f32 %v920_v21, %v513_v42 }
 0x163   : > { %v601_v45 = vadd.f32 %v569_v43, %v514_v44  ;;  %v550_v43 = vld [vmem:[%s1147_s3 + $0x8] sm:$0xff] }
 0x164   : > { %v292_v46 = vpop.trf.xlu0 }
 0x165   : > { %634 = vst.msk [vmem:[%s930_s6 + $0xa0] sm:$0xff] %vm613_vm2, %v601_v45  ;;  %764 = vmatmul.msk.f32.gmra.mxu0 %vm335_vm1, %v292_v46 }
 0x168   : > { %v516_v47 = vpop.f32.mrf.mxu2 }
 0x169   : > { %v517_v49 = vadd.f32 %v920_v21, %v516_v47  ;;  %v551_v47 = vld [vmem:[%s1147_s3 + $0x10] sm:$0xff] }
 0x16b   : > { %v602_v50 = vadd.f32 %v570_v48, %v517_v49 }
 0x16c   : > { %v293_v51 = vpop.trf.xlu0 }
 0x16d   : > { %635 = vst.msk [vmem:[%s930_s6 + $0xa8] sm:$0xff] %vm613_vm2, %v602_v50  ;;  %765 = vmatmul.msk.f32.gmra.mxu0 %vm335_vm1, %v293_v51  ;;  %v552_v51 = vld [vmem:[%s1147_s3 + $0x18] sm:$0xff] }
 0x170   : > { %v519_v52 = vpop.f32.mrf.mxu2 }
 0x171   : > { %v520_v54 = vadd.f32 %v920_v21, %v519_v52 }
 0x173   : > { %v603_v55 = vadd.f32 %v571_v53, %v520_v54 }
 0x174   : > { %v294_v56 = vpop.trf.xlu0 }
 0x175   : > { %636 = vst.msk [vmem:[%s930_s6 + $0xb0] sm:$0xff] %vm613_vm2, %v603_v55  ;;  %766 = vmatmul.msk.f32.gmra.mxu0 %vm335_vm1, %v294_v56  ;;  %v553_v55 = vld [vmem:[%s1147_s3 + $0x20] sm:$0xff] }
 0x178   : > { %v522_v57 = vpop.f32.mrf.mxu2 }
 0x179   : > { %v523_v59 = vadd.f32 %v920_v21, %v522_v57 }
 0x17b   : > { %v604_v60 = vadd.f32 %v572_v58, %v523_v59  ;;  %v554_v59 = vld [vmem:[%s1147_s3 + $0x28] sm:$0xff] }
 0x17c   : > { %v295_v61 = vpop.trf.xlu0 }
 0x17d   : > { %637 = vst.msk [vmem:[%s930_s6 + $0xb8] sm:$0xff] %vm613_vm2, %v604_v60  ;;  %767 = vmatmul.msk.f32.vlgmr.msra.gmra.mxu1 %vm335_vm1, %v295_v61 }
 0x180   : > { %v525_v62 = vpop.f32.mrf.mxu3 }
 0x181   : > { %v526_v0 = vadd.f32 %v920_v21, %v525_v62 }
 0x183   : > { %v605_v1 = vadd.f32 %v573_v63, %v526_v0  ;;  %v555_v63 = vld [vmem:[%s1147_s3 + $0x30] sm:$0xff] }
 0x184   : > { %v296_v2 = vpop.trf.xlu0 }
 0x185   : > { %638 = vst.msk [vmem:[%s930_s6 + $0xc0] sm:$0xff] %vm613_vm2, %v605_v1  ;;  %768 = vmatmul.msk.f32.gmra.mxu1 %vm335_vm1, %v296_v2 }
 0x188   : > { %v528_v3 = vpop.f32.mrf.mxu3 }
 0x189   : > { %v529_v5 = vadd.f32 %v920_v21, %v528_v3  ;;  %v556_v3 = vld [vmem:[%s1147_s3 + $0x38] sm:$0xff] }
 0x18b   : > { %v606_v6 = vadd.f32 %v574_v4, %v529_v5 }
 0x18c   : > { %v297_v7 = vpop.trf.xlu0 }
 0x18d   : > { %639 = vst.msk [vmem:[%s930_s6 + $0xc8] sm:$0xff] %vm613_vm2, %v606_v6  ;;  %769 = vmatmul.msk.f32.gmra.mxu1 %vm335_vm1, %v297_v7  ;;  %v557_v7 = vld [vmem:[%s1147_s3 + $0x40] sm:$0xff] }
 0x190   : > { %v531_v8 = vpop.f32.mrf.mxu3 }
 0x191   : > { %v532_v10 = vadd.f32 %v920_v21, %v531_v8 }
 0x193   : > { %v607_v11 = vadd.f32 %v575_v9, %v532_v10 }
 0x194   : > { %v298_v12 = vpop.trf.xlu0 }
 0x195   : > { %640 = vst.msk [vmem:[%s930_s6 + $0xd0] sm:$0xff] %vm613_vm2, %v607_v11  ;;  %770 = vmatmul.msk.f32.gmra.mxu1 %vm335_vm1, %v298_v12  ;;  %v558_v11 = vld [vmem:[%s1147_s3 + $0x48] sm:$0xff] }
 0x198   : > { %v534_v13 = vpop.f32.mrf.mxu3 }
 0x199   : > { %v535_v15 = vadd.f32 %v920_v21, %v534_v13 }
 0x19b   : > { %v608_v16 = vadd.f32 %v576_v14, %v535_v15  ;;  %v559_v15 = vld [vmem:[%s1147_s3 + $0x50] sm:$0xff] }
 0x19c   : > { %v299_v17 = vpop.trf.xlu0 }
 0x19d   : > { %641 = vst.msk [vmem:[%s930_s6 + $0xd8] sm:$0xff] %vm613_vm2, %v608_v16  ;;  %771 = vmatmul.msk.f32.gmra.mxu1 %vm335_vm1, %v299_v17 }
 0x1a0   : > { %v537_v18 = vpop.f32.mrf.mxu3 }
 0x1a1   : > { %v538_v20 = vadd.f32 %v920_v21, %v537_v18 }
 0x1a3   : > { %v609_v22 = vadd.f32 %v577_v19, %v538_v20  ;;  %v560_v19 = vld [vmem:[%s1147_s3 + $0x58] sm:$0xff] }
 0x1a4   : > { %v300_v23 = vpop.trf.xlu0 }
 0x1a5   : > { %642 = vst.msk [vmem:[%s930_s6 + $0xe0] sm:$0xff] %vm613_vm2, %v609_v22  ;;  %772 = vmatmul.msk.f32.gmra.mxu1 %vm335_vm1, %v300_v23 }
 0x1a8   : > { %v540_v24 = vpop.f32.mrf.mxu3 }
 0x1a9   : > { %v541_v26 = vadd.f32 %v920_v21, %v540_v24  ;;  %v561_v24 = vld [vmem:[%s1147_s3 + $0x60] sm:$0xff] }
 0x1ab   : > { %v610_v27 = vadd.f32 %v578_v25, %v541_v26 }
 0x1ac   : > { %v301_v28 = vpop.trf.xlu0 }
 0x1ad   : > { %643 = vst.msk [vmem:[%s930_s6 + $0xe8] sm:$0xff] %vm613_vm2, %v610_v27  ;;  %773 = vmatmul.msk.f32.gmra.mxu1 %vm335_vm1, %v301_v28  ;;  %v562_v28 = vld [vmem:[%s1147_s3 + $0x68] sm:$0xff] }
 0x1b0   : > { %v543_v29 = vpop.f32.mrf.mxu3 }
 0x1b1   : > { %v544_v31 = vadd.f32 %v920_v21, %v543_v29 }
 0x1b3   : > { %v611_v32 = vadd.f32 %v579_v30, %v544_v31 }
 0x1b4   : > { %v302_v33 = vpop.trf.xlu0 }
 0x1b5   : > { %644 = vst.msk [vmem:[%s930_s6 + $0xf0] sm:$0xff] %vm613_vm2, %v611_v32  ;;  %774 = vmatmul.msk.f32.gmra.mxu1 %vm335_vm1, %v302_v33  ;;  %v563_v32 = vld [vmem:[%s1147_s3 + $0x70] sm:$0xff] }
 0x1b8   : > { %v546_v34 = vpop.f32.mrf.mxu3 }
 0x1b9   : > { %v547_v36 = vadd.f32 %v920_v21, %v546_v34 }
 0x1ba   : > { %v453_v37 = vpop.f32.mrf.mxu0 }
 0x1bb   : > { %v612_v39 = vadd.f32 %v580_v35, %v547_v36  ;;  %v454_v40 = vadd.f32 %v920_v21, %v453_v37  ;;  %v564_v36 = vld [vmem:[%s1147_s3 + $0x78] sm:$0xff] }
 0x1bd   : > { %645 = vst.msk [vmem:[%s930_s6 + $0xf8] sm:$0xff] %vm613_vm2, %v612_v39  ;;  %v581_v41 = vadd.f32 %v549_v38, %v454_v40 }
 0x1bf   : > { %614 = vst.msk [vmem:[%s930_s6] sm:$0xff] %vm613_vm2, %v581_v41 }
 0x1c2   : > { %v456_v42 = vpop.f32.mrf.mxu0 }
 0x1c3   : > { %v457_v44 = vadd.f32 %v920_v21, %v456_v42 }
 0x1c5   : > { %v582_v45 = vadd.f32 %v550_v43, %v457_v44 }
 0x1c7   : > { %615 = vst.msk [vmem:[%s930_s6 + $0x8] sm:$0xff] %vm613_vm2, %v582_v45 }
 0x1ca   : > { %v459_v46 = vpop.f32.mrf.mxu0 }
 0x1cb   : > { %v460_v48 = vadd.f32 %v920_v21, %v459_v46 }
 0x1cd   : > { %v583_v49 = vadd.f32 %v551_v47, %v460_v48 }
 0x1cf   : > { %616 = vst.msk [vmem:[%s930_s6 + $0x10] sm:$0xff] %vm613_vm2, %v583_v49 }
 0x1d2   : > { %v462_v50 = vpop.f32.mrf.mxu0 }
 0x1d3   : > { %v463_v52 = vadd.f32 %v920_v21, %v462_v50 }
 0x1d5   : > { %v584_v53 = vadd.f32 %v552_v51, %v463_v52 }
 0x1d7   : > { %617 = vst.msk [vmem:[%s930_s6 + $0x18] sm:$0xff] %vm613_vm2, %v584_v53 }
 0x1da   : > { %v465_v54 = vpop.f32.mrf.mxu0 }
 0x1db   : > { %v466_v56 = vadd.f32 %v920_v21, %v465_v54 }
 0x1dd   : > { %v585_v57 = vadd.f32 %v553_v55, %v466_v56 }
 0x1df   : > { %618 = vst.msk [vmem:[%s930_s6 + $0x20] sm:$0xff] %vm613_vm2, %v585_v57 }
 0x1e2   : > { %v468_v58 = vpop.f32.mrf.mxu0 }
 0x1e3   : > { %v469_v60 = vadd.f32 %v920_v21, %v468_v58 }
 0x1e5   : > { %v586_v61 = vadd.f32 %v554_v59, %v469_v60 }
 0x1e7   : > { %619 = vst.msk [vmem:[%s930_s6 + $0x28] sm:$0xff] %vm613_vm2, %v586_v61 }
 0x1ea   : > { %v471_v62 = vpop.f32.mrf.mxu0 }
 0x1eb   : > { %v472_v0 = vadd.f32 %v920_v21, %v471_v62 }
 0x1ed   : > { %v587_v1 = vadd.f32 %v555_v63, %v472_v0 }
 0x1ef   : > { %620 = vst.msk [vmem:[%s930_s6 + $0x30] sm:$0xff] %vm613_vm2, %v587_v1 }
 0x1f2   : > { %v474_v2 = vpop.f32.mrf.mxu0 }
 0x1f3   : > { %v475_v4 = vadd.f32 %v920_v21, %v474_v2 }
 0x1f5   : > { %v588_v5 = vadd.f32 %v556_v3, %v475_v4 }
 0x1f7   : > { %621 = vst.msk [vmem:[%s930_s6 + $0x38] sm:$0xff] %vm613_vm2, %v588_v5 }
 0x1fa   : > { %v477_v6 = vpop.f32.mrf.mxu1 }
 0x1fb   : > { %v478_v8 = vadd.f32 %v920_v21, %v477_v6 }
 0x1fd   : > { %v589_v9 = vadd.f32 %v557_v7, %v478_v8 }
 0x1ff   : > { %622 = vst.msk [vmem:[%s930_s6 + $0x40] sm:$0xff] %vm613_vm2, %v589_v9 }
 0x202   : > { %v480_v10 = vpop.f32.mrf.mxu1 }
 0x203   : > { %v481_v12 = vadd.f32 %v920_v21, %v480_v10 }
 0x205   : > { %v590_v13 = vadd.f32 %v558_v11, %v481_v12 }
 0x207   : > { %623 = vst.msk [vmem:[%s930_s6 + $0x48] sm:$0xff] %vm613_vm2, %v590_v13 }
 0x20a   : > { %v483_v14 = vpop.f32.mrf.mxu1 }
 0x20b   : > { %v484_v16 = vadd.f32 %v920_v21, %v483_v14 }
 0x20d   : > { %v591_v17 = vadd.f32 %v559_v15, %v484_v16 }
 0x20f   : > { %624 = vst.msk [vmem:[%s930_s6 + $0x50] sm:$0xff] %vm613_vm2, %v591_v17 }
 0x212   : > { %v486_v18 = vpop.f32.mrf.mxu1 }
 0x213   : > { %v487_v20 = vadd.f32 %v920_v21, %v486_v18 }
 0x215   : > { %v592_v22 = vadd.f32 %v560_v19, %v487_v20 }
 0x217   : > { %625 = vst.msk [vmem:[%s930_s6 + $0x58] sm:$0xff] %vm613_vm2, %v592_v22 }
 0x21a   : > { %v489_v23 = vpop.f32.mrf.mxu1 }
 0x21b   : > { %v490_v25 = vadd.f32 %v920_v21, %v489_v23 }
 0x21d   : > { %v593_v26 = vadd.f32 %v561_v24, %v490_v25 }
 0x21f   : > { %626 = vst.msk [vmem:[%s930_s6 + $0x60] sm:$0xff] %vm613_vm2, %v593_v26 }
 0x222   : > { %v492_v27 = vpop.f32.mrf.mxu1 }
 0x223   : > { %v493_v29 = vadd.f32 %v920_v21, %v492_v27 }
 0x225   : > { %v594_v30 = vadd.f32 %v562_v28, %v493_v29 }
 0x227   : > { %627 = vst.msk [vmem:[%s930_s6 + $0x68] sm:$0xff] %vm613_vm2, %v594_v30 }
 0x22a   : > { %v495_v31 = vpop.f32.mrf.mxu1 }
 0x22b   : > { %v496_v33 = vadd.f32 %v920_v21, %v495_v31 }
 0x22d   : > { %v595_v34 = vadd.f32 %v563_v32, %v496_v33 }
 0x22f   : > { %628 = vst.msk [vmem:[%s930_s6 + $0x70] sm:$0xff] %vm613_vm2, %v595_v34 }
 0x232   : > { %v498_v35 = vpop.f32.mrf.mxu1 }
 0x233   : > { %v499_v37 = vadd.f32 %v920_v21, %v498_v35 }
 0x235   : > { %v596_v38 = vadd.f32 %v564_v36, %v499_v37 }
 0x237   : > { %629 = vst.msk [vmem:[%s930_s6 + $0x78] sm:$0xff] %vm613_vm2, %v596_v38 }
 0x238 PF: > { %s14_s17 = sadd.s32 1, %s846_s17   ;;  %s1149_s15 = smov %s842_s16 }
 0x239   : > { %p11_p5 = scmp.ge.s32.totalorder %s14_s17, 4   ;;  %s1150_s16 = smov %s1152_s18 }
 0x23b   :  { %13 = sbr.rel (!%p11_p5) target bundleno = 2 (0x2), region = 69 }

</bundles_post_ra>
